<compile_context>
chip_gen: v5e
topology: v5e:2x2
jax: 0.10.0
libtpu: 0.0.40
codegen_flags: <defaults>
</compile_context>

<pallas_src>
import jax
import jax.numpy as jnp
from jax.experimental import pallas as pl
from jax.experimental.pallas import tpu as pltpu


# ---------------------------------------------------------------------------
# Pallas kernel: one lane-dense tile of the im2col matmul.
# ---------------------------------------------------------------------------
def _coordconv_matmul_kernel(w_ref, p_ref, o_ref):
    """w_ref: (Cout, Kp)  flattened OIHW conv weights, bias folded into column K.
    p_ref: (Kp,  TM)   im2col patch tile; lanes = flattened (feat, batch, ho, wo).
    o_ref: (Cout, TM)  lane-dense output tile (Cout on sublanes).
    """
    o_ref[...] = jnp.dot(
        w_ref[...], p_ref[...], preferred_element_type=jnp.float32
    ).astype(o_ref.dtype)


# ---------------------------------------------------------------------------
# Plain-JAX glue.
# ---------------------------------------------------------------------------
def _round_up(x, m):
    return ((x + m - 1) // m) * m


def _pick_m_tile(m_total):
    """Lane-dense (multiple-of-128) tile of M, preferring >=2 grid steps (v7x 2 TCs)."""
    m128 = _round_up(m_total, 128)
    if m128 <= 128:
        return 128
    return int(min(1024, _round_up(m128 // 2, 128)))


def _make_coord_channels(feat_nchw):
    """Coordinate channels exactly as the torch module builds them (meshgrid 'ij')."""
    B, _, H, W = feat_nchw.shape
    dt = feat_nchw.dtype
    row = jnp.linspace(-1.0, 1.0, H, dtype=dt)   # torch's `w` linspace (varies along dim -2)
    col = jnp.linspace(-1.0, 1.0, W, dtype=dt)   # torch's `h` linspace (varies along dim -1)
    y = jnp.broadcast_to(row[:, None], (H, W))
    x = jnp.broadcast_to(col[None, :], (H, W))
    xb = jnp.broadcast_to(x[None, None], (B, 1, H, W))
    yb = jnp.broadcast_to(y[None, None], (B, 1, H, W))
    return xb, yb


def _im2col(feat_nchw, KH, KW, stride, padding):
    """NCHW (coords already appended) -> patches (K, B*HO*WO), K = C*KH*KW.

    Row index k = c*KH*KW + kh*KW + kw matches weight.reshape(Cout, C*KH*KW).
    Column index m = b*HO*WO + ho*WO + wo.
    """
    B, C, H, W = feat_nchw.shape
    HO = (H + 2 * padding - KH) // stride + 1
    WO = (W + 2 * padding - KW) // stride + 1
    xp = jnp.pad(feat_nchw, ((0, 0), (0, 0), (padding, padding), (padding, padding)))
    cols = []
    for kh in range(KH):
        for kw in range(KW):
            cols.append(xp[:, :, kh:kh + HO * stride:stride, kw:kw + WO * stride:stride])
    p = jnp.stack(cols, axis=2).reshape(B, C * KH * KW, HO * WO)   # tap = kh*KW+kw
    p = jnp.transpose(p, (1, 0, 2)).reshape(C * KH * KW, B * HO * WO)
    return p, (B, HO, WO)


def coordconv_forward(feats, weight_oihw, bias, *, stride=1, padding=1):
    """Module forward: applies the same CoordConv to every feature map in the list,
    fused into a single Pallas call."""
    Cout, Cin2, KH, KW = weight_oihw.shape
    K = Cin2 * KH * KW
    dtype = feats[0].dtype

    # --- coord channels + im2col per feature map; fuse every map/batch along M ---
    per_feat_patches = []
    shapes = []
    for f in feats:
        assert f.shape[1] + 2 == Cin2, (f.shape, Cin2)
        xb, yb = _make_coord_channels(f)
        cat = jnp.concatenate([f.astype(dtype), xb, yb], axis=1)   # (B, Cin+2, H, W)
        p, shp = _im2col(cat, KH, KW, stride, padding)
        per_feat_patches.append(p)
        shapes.append(shp)

    patches = jnp.concatenate(per_feat_patches, axis=1)            # (K, M_total)
    M_total = patches.shape[1]

    TM = _pick_m_tile(M_total)
    Mp = _round_up(M_total, TM)

    # Contraction dim padded to >=64 / multiple of 8; bias folded via ones-row.
    Kp = max(64, _round_up(K + 1, 8))
    patches = jnp.pad(patches, ((0, 0), (0, Mp - M_total)))
    ones_row = jnp.ones((1, Mp), dtype)
    pad_rows = jnp.zeros((Kp - K - 1, Mp), dtype)
    patches_p = jnp.concatenate([patches, ones_row, pad_rows], axis=0)   # (Kp, Mp)

    w_mat = weight_oihw.reshape(Cout, K).astype(dtype)
    w_p = jnp.concatenate(
        [w_mat, bias.reshape(Cout, 1).astype(dtype),
         jnp.zeros((Cout, Kp - K - 1), dtype)],
        axis=1,
    )                                                              # (Cout, Kp)

    out_flat = pl.pallas_call(
        _coordconv_matmul_kernel,
        out_shape=jax.ShapeDtypeStruct((Cout, Mp), dtype),
        grid=(Mp // TM,),
        in_specs=[
            pl.BlockSpec((Cout, Kp), lambda m: (0, 0)),   # weights resident across tiles
            pl.BlockSpec((Kp, TM), lambda m: (0, m)),     # lane-dense patch tile
        ],
        out_specs=pl.BlockSpec((Cout, TM), lambda m: (0, m)),      # lane-dense store
        compiler_params=pltpu.CompilerParams(dimension_semantics=("parallel",)),
    )(w_p, patches_p)

    # --- split the fused M axis back into per-feature NCHW outputs ---
    outs = []
    off = 0
    for (B, HO, WO) in shapes:
        m = B * HO * WO
        o = out_flat[:, off:off + m].reshape(Cout, B, HO, WO)
        outs.append(jnp.transpose(o, (1, 0, 2, 3)))                # (B, Cout, HO, WO)
        off += m
    return outs


# ---------------------------------------------------------------------------
# Pure-JAX reference (lax conv) for correctness checking.
# ---------------------------------------------------------------------------
def _reference_coordconv(feat_nchw, weight_oihw, bias, *, stride=1, padding=1):
    xb, yb = _make_coord_channels(feat_nchw)
    feat_cat = jnp.concatenate([feat_nchw, xb, yb], axis=1)
    out = jax.lax.conv_general_dilated(
        feat_cat, weight_oihw,
        window_strides=(stride, stride),
        padding=((padding, padding), (padding, padding)),
        dimension_numbers=("NCHW", "OIHW", "NCHW"),
        precision=jax.lax.Precision.HIGHEST,
    )
    return out + bias[None, :, None, None]


if __name__ == "__main__":
    # CoordConv(in_channels=4, out_channels=8, kernel_size=3, stride=1, padding=1)
    in_channels, out_channels = 4, 8
    kernel_size, stride, padding = 3, 1, 1

    key = jax.random.PRNGKey(0)
    k_w, k_f1, k_f2 = jax.random.split(key, 3)

    # Deterministic init matching weight_init(): normal(std=0.01) weights, zero bias.
    weight = (jax.random.normal(
        k_w, (out_channels, in_channels + 2, kernel_size, kernel_size),
        dtype=jnp.float32) * 0.01)
    bias = jnp.zeros((out_channels,), dtype=jnp.float32)

    # Forward takes a list of feature maps (NCHW); both are handled in ONE pallas_call.
    feats = [
        jax.random.normal(k_f1, (2, in_channels, 16, 16), dtype=jnp.float32),
        jax.random.normal(k_f2, (2, in_channels, 8, 8), dtype=jnp.float32),
    ]

    outs = coordconv_forward(feats, weight, bias, stride=stride, padding=padding)
    outs = [jax.block_until_ready(o) for o in outs]

    # Verify against the pure-JAX reference.
    for f, o in zip(feats, outs):
        ref = _reference_coordconv(f, weight, bias, stride=stride, padding=padding)
        assert o.shape == ref.shape, (o.shape, ref.shape)
        assert jnp.allclose(o, ref, rtol=1e-3, atol=2e-4), "mismatch vs reference"

    print("KERNEL_OK")
</pallas_src>

<mosaic_0001>
module attributes {stable_mosaic.version = 11 : i64} {
  func.func @_coordconv_matmul_kernel(%arg0: i32, %arg1: memref<8x64xf32, #tpu.memory_space<vmem>>, %arg2: memref<64x384xf32, #tpu.memory_space<vmem>>, %arg3: memref<8x384xf32, #tpu.memory_space<vmem>>) attributes {dimension_semantics = [#tpu.dimension_semantics<parallel>], iteration_bounds = array<i64: 2>, scalar_prefetch = 0 : i64, scratch_operands = 0 : i64, tpu.core_type = #tpu.core_type<tc>, window_params = [{pipeline_mode = #tpu.pipeline_mode<synchronous>, transform_indices = @transform_0, window_bounds = array<i64: 8, 64>}, {transform_indices = @transform_1, window_bounds = array<i64: 64, 384>}, {transform_indices = @transform_2, window_bounds = array<i64: 8, 384>}]} {
    %c0 = arith.constant 0 : index
    %c0_0 = arith.constant 0 : index
    %0 = vector.load %arg1[%c0, %c0_0] : memref<8x64xf32, #tpu.memory_space<vmem>>, vector<8x64xf32>
    %c0_1 = arith.constant 0 : index
    %c0_2 = arith.constant 0 : index
    %1 = vector.load %arg2[%c0_1, %c0_2] : memref<64x384xf32, #tpu.memory_space<vmem>>, vector<64x384xf32>
    %cst = arith.constant dense<0.000000e+00> : vector<8x384xf32>
    %2 = tpu.matmul %0, %1, %cst {dimension_numbers = #tpu.dot_dimension_numbers<[1], [0], [0], [1], [0, 0, 1, 1], [], []>} : vector<8x64xf32>, vector<64x384xf32>, vector<8x384xf32> -> vector<8x384xf32>
    %c0_3 = arith.constant 0 : index
    %c0_4 = arith.constant 0 : index
    %3 = vector.load %arg3[%c0_3, %c0_4] : memref<8x384xf32, #tpu.memory_space<vmem>>, vector<8x384xf32>
    tpu.vector_store %arg3[%c0_3, %c0_4], %2 {strides = array<i32>} : memref<8x384xf32, #tpu.memory_space<vmem>>, vector<8x384xf32>,
    return
  }
  func.func @transform_0(%arg0: i32) -> (i32, i32) {
    %c0_i32 = arith.constant 0 : i32
    %c0_i32_0 = arith.constant 0 : i32
    %c0_i32_1 = arith.constant 0 : i32
    return %c0_i32, %c0_i32_0 : i32, i32
  }
  func.func @transform_1(%arg0: i32) -> (i32, i32) {
    %c0_i32 = arith.constant 0 : i32
    %c0_i32_0 = arith.constant 0 : i32
    return %c0_i32, %arg0 : i32, i32
  }
  func.func @transform_2(%arg0: i32) -> (i32, i32) {
    %c0_i32 = arith.constant 0 : i32
    %c0_i32_0 = arith.constant 0 : i32
    return %c0_i32, %arg0 : i32, i32
  }
}

</mosaic_0001>

<bundles_post_ra>
// kernel: tpu_custom_call.1
= control target key start
LH: loop header
LB: loop body
LE: loop exit
PB: predicated region body
PF: predicated region fallthrough
CT: control target
= control target key end

     0   :  { %7 = vsyncpa [#allocation3], 0  ;;  %s770_s0 = inlined_call_operand.hbm [shape: f32[8,64], index: 0, kind: input, shape index: {}]   ;;  %s771_s1 = inlined_call_operand.hbm [shape: f32[64,768], index: 1, kind: input, shape index: {}]   ;;  %s772_s2 = inlined_call_operand.hbm [shape: f32[8,768], index: 2, kind: output, shape index: {}]  }
   0x1   :  { %8 = vsyncpa [#allocation6], 0 }
   0x2   :  { %10 = vsyncpa [#allocation6 + $0x1], 0 }
   0x3   :  { %11 = vsyncpa [#allocation4], 0 }
   0x4   :  { %13 = vsyncpa [#allocation4 + $0x1], 0  ;;  %s601_s9 = smov 0   ;;  %s603_s10 = smov 0  }
   0x5   :  { %s605_s11 = smov 0   ;;  %s607_s12 = smov 0  }
   0x6 LB: > { %s622_s13 = sadd.s32 4294967295, %s580_s12   ;;  %s372_s14 = sadd.s32 4294967294, %s580_s12   ;;  %s580_s12 = sphi %s607_s12, %s783_s12   ;;  %s576_s11 = sphi %s605_s11, %s782_s11   ;;  %s572_s10 = sphi %s603_s10, %s781_s10   ;;  %s568_s9 = sphi %s601_s9, %s780_s9  }
   0x7   : > { %s626_s15 = sadd.s32 1, %s580_s12   ;;  %s47_s16 = sadd.s32 1, %s576_s11 }
   0x8   : > { %s44_s17 = ssub.s32 %s580_s12, %s626_s15  ;;  %p54_p0 = scmp.ne.s32.totalorder %s576_s11, %s572_s10 }
   0x9   : > { %p45_p1 = scmp.eq.s32.totalorder %s44_s17, 0  ;;  %p55_p2 = scmp.eq.s32.totalorder %s580_s12, 0 }
   0xa   : > { %p60_p3 = scmp.ne.s32.totalorder %s572_s10, %s568_s9  ;;  %p61_p4 = scmp.eq.s32.totalorder %s622_s13, 0 }
   0xb   : > { %s638_s18 = scalar_select %p45_p1, %s576_s11, %s47_s16  }
   0xc   : > { %p640_p5 = por %p55_p2, %p54_p0  ;;  %p646_p6 = por %p61_p4, %p60_p3 }
   0xd   : > { %p84_p7 = scmp.eq.s32.totalorder %s622_s13, 1  ;;  %p90_p8 = scmp.eq.s32.totalorder %s372_s14, 1 }
   0xe   : > { %p373_p9 = scmp.ge.s32.totalorder %s580_s12, 1  ;;  %p97_p10 = scmp.lt.s32.totalorder %s580_s12, 3 }
   0xf   : > { %p653_p11 = por %p84_p7, %p54_p0  ;;  %p657_p12 = por %p90_p8, %p60_p3 }
  0x10   : > { %p661_p13 = pnand %p373_p9, %p97_p10  ;;  %s109_s26 = sshll.u32 %s770_s0, 4  ;;  %s110_s26 = int_to_ptr.hbm [resolvable:$true] %s109_s26 }
  0x11   : > { %s582_s27 = smov [#allocation2]   ;;  %p411_p3 = scmp.lt.s32.totalorder %s580_s12, 2 }
  0x12   : > { %p398_p1 = pneg %p661_p13  ;;  %s111_s28 = sshll.u32 %s582_s27, 4  ;;  %s112_s28 = int_to_ptr.vmem [resolvable:$true] %s111_s28 }
  0x13   : > { %s122_s29 = sand.u32 1, %s576_s11   ;;  %p677_p7 = pnand %p411_p3, %p640_p5 }
  0x14   : > { %p399_p2 = pnand %p398_p1, %p61_p4  ;;  %s387_s3 = smul.u32 192, %s122_s29 }
  0x15   : > { %s385_s4 = smul.u32 24, %s580_s12  ;;  %s123_s17 = scalar_lea.sflag [#allocation6], %s122_s29 }
  0x16   : > { %401 = dma.hbm_to_vmem [thread:$0]  (!%p399_p2), %s110_s26, 128, %s112_s28, [#allocation3]  }
  0x17   : > { %s131_s7 = scalar_lea.hbm %s771_s1, %s385_s4  ;;  %s126_s8 = scalar_lea.vmem [#allocation5], %s387_s3 }
  0x18   : > { %s134_s14 = sshll.u32 %s126_s8, 4  ;;  %s132_s16 = sshll.u32 %s131_s7, 4  ;;  %s135_s14 = int_to_ptr.vmem [resolvable:$true] %s134_s14  ;;  %s133_s16 = int_to_ptr.hbm [resolvable:$true] %s132_s16 }
  0x19   : > { %s480_s24 = sshra.s32 %s133_s16, 4  ;;  %p484_p8 = pneg %p677_p7  ;;  %s481_s24 = int_to_ptr.hbm [resolvable:$true] %s480_s24 }
  0x1a   : > { %s482_s19 = scalar_lea.hbm %s481_s24, 192  ;;  %s487_s27 = scalar_lea.hbm %s771_s1, 384 }
  0x1b   : > { %p483_p5 = scmp.ne.s32.totalorder %s481_s24, %s482_s19  ;;  %p488_p1 = scmp.lt.s32.totalorder %s481_s24, %s771_s1 }
  0x1c   : > { %p489_p2 = scmp.lt.s32.totalorder %s487_s27, %s482_s19 }
  0x1d   : > { %p485_p9 = pnand %p484_p8, %p483_p5 }
  0x1e   : > { %p490_p3 = por %p489_p2, %p488_p1 }
  0x1f   : > { %p486_p10 = pneg %p485_p9 }
  0x21   : > { %p491_p0 = pnand %p490_p3, %p486_p10 }
  0x23   : > { %494 = shalt.err (!%p491_p0)
}
  0x24   : > { %s583_s29 = smov 768   ;;  %s584_s3 = smov 384  }
  0x25   : > { %s585_s5 = smov 24   ;;  %146 = sbr.rel (%p661_p13) target bundleno = 199 (0xc7), region = 28 }
  0x26   : > { %405 = dma.hbm_to_vmem [thread:$0]  (!%p677_p7), %s133_s16, 3072, %s135_s14, %s123_s17, %s583_s29, %s584_s3, %s585_s5  }
  0x2a   : > { %555 = dma.done.wait (%p61_p4), [#allocation3], 128  }
  0x2b   : > { %557 = vsyncadd (%p61_p4), [#allocation3], 4294967168  ;;  %s702_s6 = sand.u32 1, %s572_s10  }
  0x2c   : > { %s388_s7 = smul.u32 192, %s702_s6  ;;  %s154_s8 = scalar_lea.sflag [#allocation6], %s702_s6 }
  0x2e   : > { %s706_s24 = scalar_lea.vmem [#allocation5], %s388_s7 }
  0x2f   : > { %559 = dma.done.wait (%p646_p6), %s154_s8, 3072  }
  0x30   : > { %561 = vsyncadd (%p646_p6), %s154_s8, 4294964224  ;;  %v205_v0 = vld [vmem:[%s706_s24 + $0xb8] sm:$0xff]  ;;  %v202_v1 = vld [vmem:[%s706_s24 + $0xa0] sm:$0xff]  ;;  %vm206_vm0 = vcmask 523264   ;;  %s389_s20 = smul.u32 24, %s702_s6  ;;  %s274_s26 = scalar_lea.sflag [#allocation4], %s702_s6 }
  0x31   : > { %258 = vmatpush.msra.mxu2 %v205_v0  ;;  %v203_v2 = vld [vmem:[%s706_s24 + $0xa8] sm:$0xff]  ;;  %v204_v3 = vld [vmem:[%s706_s24 + $0xb0] sm:$0xff]  ;;  %v201_v6 = vld [vmem:[%s706_s24 + $0x98] sm:$0xff]  ;;  %s386_s23 = smul.u32 24, %s622_s13  ;;  %s530_s29 = scalar_lea.hbm %s772_s2, 48 }
  0x32   : > { %v199_v4 = vld [vmem:[%s706_s24 + $0x88] sm:$0xff]  ;;  %218 = vmatpush.msra.mxu0 %v203_v2  ;;  %238 = vmatpush.msra.mxu1 %v204_v3  ;;  %v200_v5 = vld [vmem:[%s706_s24 + $0x90] sm:$0xff]  ;;  %v197_v7 = vld [vmem:[%s706_s24 + $0x78] sm:$0xff]  ;;  %s178_s17 = scalar_lea.vmem [#allocation7], %s389_s20 }
  0x33   : > { %259 = vmatpush.msra.mxu2 %v202_v1  ;;  %v198_v8 = vld [vmem:[%s706_s24 + $0x80] sm:$0xff]  ;;  %v196_v9 = vld [vmem:[%s706_s24 + $0x70] sm:$0xff]  ;;  %v195_v11 = vld [vmem:[%s706_s24 + $0x68] sm:$0xff]  ;;  %s285_s16 = scalar_lea.hbm %s772_s2, %s386_s23  ;;  %s287_s19 = sshll.u32 %s178_s17, 4  ;;  %s288_s19 = int_to_ptr.vmem [resolvable:$true] %s287_s19 }
  0x34   : > { %219 = vmatpush.msra.mxu0 %v200_v5  ;;  %239 = vmatpush.msra.mxu1 %v201_v6  ;;  %v194_v10 = vld [vmem:[%s706_s24 + $0x60] sm:$0xff]  ;;  %v193_v12 = vld [vmem:[%s706_s24 + $0x58] sm:$0xff]  ;;  %v191_v13 = vld [vmem:[%s706_s24 + $0x48] sm:$0xff]  ;;  %s289_s25 = sshll.u32 %s285_s16, 4  ;;  %s290_s25 = int_to_ptr.hbm [resolvable:$true] %s289_s25 }
  0x35   : > { %260 = vmatpush.msra.mxu2 %v199_v4  ;;  %v192_v14 = vld [vmem:[%s706_s24 + $0x50] sm:$0xff]  ;;  %v190_v15 = vld [vmem:[%s706_s24 + $0x40] sm:$0xff]  ;;  %v189_v17 = vld [vmem:[%s706_s24 + $0x38] sm:$0xff]  ;;  %s524_s27 = sshra.s32 %s290_s25, 4  ;;  %s525_s27 = int_to_ptr.hbm [resolvable:$true] %s524_s27 }
  0x36   : > { %220 = vmatpush.msra.mxu0 %v197_v7  ;;  %240 = vmatpush.msra.mxu1 %v198_v8  ;;  %v188_v16 = vld [vmem:[%s706_s24 + $0x30] sm:$0xff]  ;;  %v187_v18 = vld [vmem:[%s706_s24 + $0x28] sm:$0xff]  ;;  %v185_v19 = vld [vmem:[%s706_s24 + $0x18] sm:$0xff]  ;;  %s526_s13 = scalar_lea.hbm %s525_s27, 24  ;;  %p531_p0 = scmp.lt.s32.totalorder %s525_s27, %s772_s2 }
  0x37   : > { %261 = vmatpush.msra.mxu2 %v196_v9  ;;  %v186_v20 = vld [vmem:[%s706_s24 + $0x20] sm:$0xff]  ;;  %v184_v21 = vld [vmem:[%s706_s24 + $0x10] sm:$0xff]  ;;  %v181_v22 = vld [vmem:[#allocation2] sm:$0xff]  ;;  %p527_p4 = scmp.ne.s32.totalorder %s525_s27, %s526_s13  ;;  %p532_p7 = scmp.lt.s32.totalorder %s530_s29, %s526_s13 }
  0x38   : > { %221 = vmatpush.msra.mxu0 %v194_v10  ;;  %241 = vmatpush.msra.mxu1 %v195_v11  ;;  %v182_v23 = vld [vmem:[%s706_s24] sm:$0xff]  ;;  %v183_v24 = vld [vmem:[%s706_s24 + $0x8] sm:$0xff] }
  0x39   : > { %262 = vmatpush.msra.mxu2 %v193_v12  ;;  %p528_p6 = pnand %p527_p4, %p653_p11  ;;  %p533_p5 = por %p532_p7, %p531_p0 }
  0x3a   : > { %222 = vmatpush.msra.mxu0 %v191_v13  ;;  %242 = vmatpush.msra.mxu1 %v192_v14 }
  0x3b   : > { %263 = vmatpush.msra.mxu2 %v190_v15  ;;  %p529_p13 = pneg %p528_p6 }
  0x3c   : > { %223 = vmatpush.msra.mxu0 %v188_v16  ;;  %243 = vmatpush.msra.mxu1 %v189_v17 }
  0x3d   : > { %264 = vmatpush.msra.mxu2 %v187_v18  ;;  %p534_p8 = pnand %p533_p5, %p529_p13 }
  0x3e   : > { %224 = vmatpush.msra.mxu0 %v185_v19  ;;  %244 = vmatpush.msra.mxu1 %v186_v20 }
  0x3f   : > { %265 = vmatpush.msra.mxu2 %v184_v21 }
  0x40   : > { %381 = vmatmul.msk.f32.vlgmr.msra.gmra.mxu2 %vm206_vm0, %v181_v22  ;;  %225 = vmatpush.msra.mxu0 %v182_v23 }
  0x41   : > { %245 = vmatpush.msra.mxu1 %v183_v24  ;;  %379 = vmatmul.msk.f32.vlgmr.msra.gmra.mxu0 %vm206_vm0, %v181_v22 }
  0x42   : > { %380 = vmatmul.msk.f32.vlgmr.msra.gmra.mxu1 %vm206_vm0, %v181_v22 }
  0xbe   : > { %v227_v25 = vpop.f32.mrf.mxu0 }
  0xbf   : > { %270 = vst [vmem:[%s178_s17] sm:$0xff] %v227_v25  ;;  %v247_v26 = vpop.f32.mrf.mxu1 }
  0xc0   : > { %271 = vst [vmem:[%s178_s17 + $0x8] sm:$0xff] %v247_v26 }
  0xc3   : > { %v267_v27 = vpop.f32.mrf.mxu2 }
  0xc4   : > { %272 = vst [vmem:[%s178_s17 + $0x10] sm:$0xff] %v267_v27 }
  0xc5   : > { %537 = shalt.err (!%p534_p8)
}
  0xc6   : > { %396 = dma.vmem_to_hbm [thread:$0]  (%p653_p11), %s288_s19, 384, %s290_s25, %s274_s26  }
  0xc7 PF: > { %s301_s6 = sand.u32 1, %s568_s9   ;;  %p779_p9 = scmp.ge.s32.totalorder %s580_s12, 2 }
  0xc8   : > { %s302_s7 = scalar_lea.sflag [#allocation4], %s301_s6 }
  0xc9   : > { %p407_p10 = pnand %p779_p9, %p657_p12 }
  0xcb   : > { %p408_p1 = pneg %p407_p10 }
  0xcd   : > { %563 = dma.done.wait (%p408_p1), %s302_s7, 384  }
  0xce   : > { %565 = vsyncadd (%p408_p1), %s302_s7, 4294966912  ;;  %p16_p2 = scmp.ge.s32.totalorder %s626_s15, 4   ;;  %s780_s9 = smov %s572_s10 }
  0xcf   : > { %s781_s10 = smov %s576_s11  ;;  %s782_s11 = smov %s638_s18 }
  0xd0   : > { %s783_s12 = smov %s626_s15  ;;  %18 = sbr.rel (!%p16_p2) target bundleno = 6 (0x6), region = 78 }
  0xd5   :  { %308 = vsyncpa [#allocation3], 1 }
  0xd6   :  { %310 = vsyncpa [#allocation3 + $0x1], 1 }
  0xd7   :  { %311 = vsyncpa [#allocation6], 1 }
  0xd8   :  { %313 = vsyncpa [#allocation6 + $0x1], 1 }
  0xd9   :  { %314 = vsyncpa [#allocation4], 1 }
  0xda   :  { %316 = vsyncpa [#allocation4 + $0x1], 1 }

</bundles_post_ra>
